<compile_context>
chip_gen: v7x
topology: tpu7x:2x2x1
jax: 0.10.0
libtpu: 0.0.40
codegen_flags: <defaults>
</compile_context>

<pallas_src>
import jax
import jax.numpy as jnp
import numpy as np
from jax import lax
from jax.experimental import pallas as pl
from jax.experimental.pallas import tpu as pltpu

# Small, module-consistent shapes.
B = 2            # batch
PATCH = 16       # patch_size
IM_H, IM_W = 64, 64
GS = IM_H // PATCH                            # 4
GW = (IM_H * IM_W) // (PATCH * PATCH) // GS   # 4
HW = GS * GW                                  # 16 tokens (patches)
D_ENC = 32                                    # d_encoder
N_CLS = 16                                    # n_cls


def decoder_linear_kernel(x_ref, w_ref, b_ref, out_ref):
    # x_ref: (B*HW, D)    bf16
    # w_ref: (N_CLS, D)   bf16  (raw PyTorch nn.Linear layout, no wrapper .T)
    # b_ref: (1, N_CLS)   f32
    # out_ref: (B*HW, N_CLS) f32
    y = lax.dot_general(
        x_ref[...], w_ref[...],
        dimension_numbers=(((1,), (1,)), ((), ())),   # x @ w.T on the MXU
        preferred_element_type=jnp.float32)
    # f32 epilogue on the VPU; single store (one vst pass, v5e-friendly).
    out_ref[...] = y + b_ref[...]


def decoder_linear_forward(x, weight, bias, im_size, patch_size):
    """x: (B, HW, D_ENC) f32; weight: (N_CLS, D_ENC) [PyTorch layout, f32 or bf16];
    bias: (N_CLS,) or (1, N_CLS)."""
    H, W = im_size
    gs = H // patch_size
    b_, hw, d = x.shape
    n_cls = weight.shape[0]

    # Wrapper-side prep: reshape is a free bitcast; the only real op is the
    # activation bf16 cast (halves input DMA bytes).  Weight/bias casts are
    # no-ops if they were precomputed at parameter-load time.
    x2d = x.reshape(b_ * hw, d).astype(jnp.bfloat16)
    w = weight if weight.dtype == jnp.bfloat16 else weight.astype(jnp.bfloat16)
    b2d = bias if bias.ndim == 2 else bias.reshape(1, n_cls)
    b2d = b2d if b2d.dtype == jnp.float32 else b2d.astype(jnp.float32)

    flops = 2 * (b_ * hw) * d * n_cls
    bytes_accessed = (x2d.size * x2d.dtype.itemsize
                      + w.size * w.dtype.itemsize
                      + b2d.size * b2d.dtype.itemsize
                      + (b_ * hw) * n_cls * 4)

    vmem = pl.BlockSpec(memory_space=pltpu.MemorySpace.VMEM)
    y2d = pl.pallas_call(
        decoder_linear_kernel,
        out_shape=jax.ShapeDtypeStruct((b_ * hw, n_cls), jnp.float32),
        in_specs=[vmem, vmem, vmem],
        out_specs=vmem,
        cost_estimate=pl.CostEstimate(flops=flops,
                                      bytes_accessed=bytes_accessed,
                                      transcendentals=0),
    )(x2d, w, b2d)

    # x.view(B, GS, HW//GS, C).permute(0, 3, 1, 2) — pure layout, done in JAX
    # on the lane-dense kernel output.
    y = y2d.reshape(b_, gs, hw // gs, n_cls)
    return jnp.transpose(y, (0, 3, 1, 2))     # (B, n_cls, GS, HW//GS)


def decoder_linear_reference(x, weight, bias, im_size, patch_size):
    H, W = im_size
    gs = H // patch_size
    b_, hw, _ = x.shape
    y = jnp.einsum("bnd,cd->bnc", x, weight) + bias        # nn.Linear
    y = y.reshape(b_, gs, hw // gs, weight.shape[0])
    return jnp.transpose(y, (0, 3, 1, 2))


if __name__ == "__main__":
    key = jax.random.PRNGKey(0)
    kx, kw, kb = jax.random.split(key, 3)

    x = jax.random.normal(kx, (B, HW, D_ENC), jnp.float32)
    weight = 0.02 * jax.random.normal(kw, (N_CLS, D_ENC), jnp.float32)
    bias = 0.02 * jax.random.normal(kb, (N_CLS,), jnp.float32)

    # "Parameter-load time" precompute: bf16 weight + (1, n_cls) f32 bias, so
    # the forward hot path emits no transpose / reshape / cast for the params.
    weight_p = weight.astype(jnp.bfloat16)
    bias_p = bias.reshape(1, N_CLS)

    out = decoder_linear_forward(x, weight_p, bias_p, (IM_H, IM_W), PATCH)
    out = jax.block_until_ready(out)

    ref = jax.block_until_ready(
        decoder_linear_reference(x, weight, bias, (IM_H, IM_W), PATCH))

    assert out.shape == (B, N_CLS, GS, GW), out.shape
    # bf16 dot operands (f32 accumulation): expect ~1e-3 relative error.
    np.testing.assert_allclose(np.asarray(out), np.asarray(ref),
                               rtol=2e-2, atol=2e-2)

    print("KERNEL_OK")
</pallas_src>

<mosaic_0001>
module attributes {stable_mosaic.version = 11 : i64} {
  func.func @decoder_linear_kernel(%arg0: memref<32x32xbf16, #tpu.memory_space<vmem>>, %arg1: memref<16x32xbf16, #tpu.memory_space<vmem>>, %arg2: memref<1x16xf32, #tpu.memory_space<vmem>>, %arg3: memref<32x16xf32, #tpu.memory_space<vmem>>) attributes {dimension_semantics = [], scalar_prefetch = 0 : i64, scratch_operands = 0 : i64, tpu.core_type = #tpu.core_type<tc>} {
    %c0 = arith.constant 0 : index
    %c0_0 = arith.constant 0 : index
    %0 = vector.load %arg0[%c0, %c0_0] : memref<32x32xbf16, #tpu.memory_space<vmem>>, vector<32x32xbf16>
    %c0_1 = arith.constant 0 : index
    %c0_2 = arith.constant 0 : index
    %1 = vector.load %arg1[%c0_1, %c0_2] : memref<16x32xbf16, #tpu.memory_space<vmem>>, vector<16x32xbf16>
    %cst = arith.constant dense<0.000000e+00> : vector<32x16xf32>
    %2 = tpu.matmul %0, %1, %cst {dimension_numbers = #tpu.dot_dimension_numbers<[1], [1], [0], [0], [0, 0, 1, 0], [], []>} : vector<32x32xbf16>, vector<16x32xbf16>, vector<32x16xf32> -> vector<32x16xf32>
    %c0_3 = arith.constant 0 : index
    %c0_4 = arith.constant 0 : index
    %3 = vector.load %arg2[%c0_3, %c0_4] : memref<1x16xf32, #tpu.memory_space<vmem>>, vector<1x16xf32>
    %4 = vector.broadcast %3 : vector<1x16xf32> to vector<32x16xf32>
    %5 = arith.addf %2, %4 : vector<32x16xf32>
    %c0_5 = arith.constant 0 : index
    %c0_6 = arith.constant 0 : index
    %6 = vector.load %arg3[%c0_5, %c0_6] : memref<32x16xf32, #tpu.memory_space<vmem>>, vector<32x16xf32>
    tpu.vector_store %arg3[%c0_5, %c0_6], %5 {strides = array<i32>} : memref<32x16xf32, #tpu.memory_space<vmem>>, vector<32x16xf32>,
    return
  }
}

</mosaic_0001>

<bundles_post_ra>
// kernel: tpu_custom_call.1
= control target key start
LH: loop header
LB: loop body
LE: loop exit
PB: predicated region body
PF: predicated region fallthrough
CT: control target
= control target key end

     0   :  { %8 = vsyncpa [#allocation3], 0  ;;  %s275_s0 = inlined_call_operand.hbm [shape: bf16[32,32], index: 0, kind: input, shape index: {}]   ;;  %s276_s1 = inlined_call_operand.hbm [shape: bf16[16,32], index: 1, kind: input, shape index: {}]   ;;  %s277_s2 = inlined_call_operand.vmem [shape: f32[1,16], index: 2, kind: input, shape index: {}]   ;;  %s278_s3 = inlined_call_operand.vmem [shape: f32[32,16], index: 3, kind: output, shape index: {}]  }
   0x1   :  { %9 = vsyncpa [#allocation5], 0  ;;  %s212_s12 = smov [#allocation2]   ;;  %s164_s16 = scalar_lea.hbm %s275_s0, 256 }
   0x2   :  { %s15_s13 = sshll.u32 %s212_s12, 4  ;;  %p165_p0 = scmp.ne.s32.totalorder %s275_s0, %s164_s16  ;;  %s16_s13 = int_to_ptr.vmem [resolvable:$true] %s15_s13 }
   0x3   :  { %p168_p1 = scmp.lt.u32.totalorder %s164_s16, %s275_s0 }
   0x5   :  { %p170_p2 = pnand %p168_p1, %p165_p0 }
   0x7   :  { %173 = shalt.err (!%p170_p2)
}
   0x8   :  { %s174_s21 = scalar_lea.vmem %s16_s13, 256  ;;  %p179_p4 = scmp.lt.s32.totalorder %s16_s13, %s16_s13 }
   0x9   :  { %p175_p3 = scmp.ne.s32.totalorder %s16_s13, %s174_s21  ;;  %p180_p5 = scmp.lt.s32.totalorder %s174_s21, %s174_s21 }
   0xb   :  { %p181_p6 = por %p180_p5, %p179_p4 }
   0xd   :  { %p182_p7 = pnand %p181_p6, %p175_p3 }
   0xf   :  { %185 = shalt.err (!%p182_p7)
}
  0x10   :  { %s213_s22 = smov 64   ;;  %s214_s23 = smov 4  }
  0x11   :  { %21 = dma.hbm_to_vmem [thread:$0]  %s275_s0, 256, %s16_s13, [#allocation3], %s213_s22, %s213_s22, %s214_s23  }
  0x12   :  { %s215_s26 = smov [#allocation4]   ;;  %s186_s30 = scalar_lea.hbm %s276_s1, 128 }
  0x13   :  { %s27_s27 = sshll.u32 %s215_s26, 4  ;;  %p187_p8 = scmp.ne.s32.totalorder %s276_s1, %s186_s30  ;;  %s28_s27 = int_to_ptr.vmem [resolvable:$true] %s27_s27 }
  0x14   :  { %p190_p9 = scmp.lt.u32.totalorder %s186_s30, %s276_s1 }
  0x16   :  { %p192_p10 = pnand %p190_p9, %p187_p8 }
  0x18   :  { %195 = shalt.err (!%p192_p10)
}
  0x19   :  { %s196_s8 = scalar_lea.vmem %s28_s27, 128  ;;  %p201_p12 = scmp.lt.s32.totalorder %s28_s27, %s28_s27 }
  0x1a   :  { %p197_p11 = scmp.ne.s32.totalorder %s28_s27, %s196_s8  ;;  %p202_p13 = scmp.lt.s32.totalorder %s196_s8, %s196_s8 }
  0x1c   :  { %p203_p0 = por %p202_p13, %p201_p12 }
  0x1e   :  { %p204_p1 = pnand %p203_p0, %p197_p11 }
  0x20   :  { %207 = shalt.err (!%p204_p1)
}
  0x21   :  { %33 = dma.hbm_to_vmem [thread:$0]  %s276_s1, 128, %s28_s27, [#allocation5], %s213_s22, %s213_s22, %s214_s23  }
  0x22   :  { %208 = dma.done.wait [#allocation3], 256  }
  0x23   :  { %209 = vsyncadd [#allocation3], 4294967040 }
  0x24   :  { %210 = dma.done.wait [#allocation5], 128  }
  0x25   :  { %211 = vsyncadd [#allocation5], 4294967168  ;;  %vm71_vm0 = vcmask 261120   ;;  %v161_v0 = vld [vmem:[#allocation4] sm:$0xff]   ;;  %v162_v1 = vld [vmem:[#allocation2] sm:$0xff]   ;;  %vm130_vm1 = vcmask 130048  }
  0x26   :  { %156 = vmatprep.subr.msk.bf16.mxu0 %vm71_vm0, %v161_v0  ;;  %v79_v2 = vsel %vm71_vm0, %v161_v0, 0  ;;  %152 = vmatprep.mubr.msk.bf16.mxu0 %vm71_vm0, %v162_v1  ;;  %v163_v3 = vld [vmem:[#allocation2 + $0x8] sm:$0xff]   ;;  %v141_v4 = vld [vmem:[%s277_s2] ss:$0 sm:$0xff] }
  0x27   :  { %151 = vmatpush3.bf16.xpose.msra.mxu0 %v79_v2 }
  0x2e   :  { %153 = vmatmul.mubr.msk.bf16.vlgmr.msra.gmra.mrb[0].mxu0 %vm71_vm0, %v163_v3 }
 0x101   :  { %v154_v5 = vpop.f32.mrb[0].mxu0 }
 0x102   :  { %v124_v6 = vadd.f32 %v154_v5, %v141_v4  ;;  %v115_v7 = vpop.f32.mrb[1].mxu0 }
 0x103   :  { %v116_v8 = vadd.f32 %v141_v4, %v115_v7  ;;  %v155_v9 = vpop.f32.mrb[2].mxu0 }
 0x104   :  { %133 = vst.msk [vmem:[%s278_s3 + $0x10] sm:$0xff] %vm130_vm1, %v124_v6  ;;  %v127_v10 = vadd.f32 %v155_v9, %v141_v4  ;;  %v118_v11 = vpop.f32.mrb[3].mxu0 }
 0x105   :  { %131 = vst.msk [vmem:[%s278_s3] sm:$0xff] %vm130_vm1, %v116_v8  ;;  %v119_v12 = vadd.f32 %v141_v4, %v118_v11 }
 0x106   :  { %134 = vst.msk [vmem:[%s278_s3 + $0x18] sm:$0xff] %vm130_vm1, %v127_v10 }
 0x107   :  { %132 = vst.msk [vmem:[%s278_s3 + $0x8] sm:$0xff] %vm130_vm1, %v119_v12 }
 0x108   :  { %139 = vsyncpa [#allocation3], 1 }
 0x109   :  { %140 = vsyncpa [#allocation5], 1 }

</bundles_post_ra>
